<compile_context>
chip_gen: v7x
topology: tpu7x:2x2x1
jax: 0.10.0
libtpu: 0.0.40
codegen_flags: <defaults>
</compile_context>

<pallas_src>
import jax
import jax.numpy as jnp
from jax import lax
from jax.experimental import pallas as pl
from jax.experimental.pallas import tpu as pltpu

# ------------------------- model dimensions (small) -------------------------
B, CIN, H, W = 2, 4, 16, 16
COUT = 8
NUM_CLASSES = 10
LANE = 128            # class dim padded to one full lane width
KDIM = 9 * CIN        # im2col contraction size (3x3 taps x Cin) = 36
KBIAS = KDIM + 1      # +1 ones row for the folded conv bias
OUT_ROWS = max(B, 8)  # output sublane padding -> full (8,128) tile


# ------------------------------ Pallas kernel -------------------------------
def bpnet_kernel(patches_ref, cw_ref, pool_ref, fw_ref, fb_ref, out_ref):
    """Fused conv3x3(same)+bias + ReLU + global-pool + linear, lane-dense.

    patches_ref : (37, B*H*W)  bf16 im2col activations + ones row (M on lanes)
    cw_ref      : (Cout, 37)   bf16 conv weights with bias column appended
    pool_ref    : (B*H*W, 8)   f32 block-of-ones pooling selector
    fw_ref      : (Cout, 128)  f32 fc weights, pre-scaled by 1/(H*W), lane-padded
    fb_ref      : (1, 128)     f32 fc bias, lane-padded
    out_ref     : (8, 128)     f32 logits (rows [:B], lanes [:NUM_CLASSES] valid)
    """
    # conv3x3 + bias as ONE im2col matmul on the MXU: (Cout, 37) @ (37, M).
    acc = jnp.dot(cw_ref[...], patches_ref[...],
                  preferred_element_type=jnp.float32)          # (Cout, M) f32
    acc = jnp.maximum(acc, 0.0)                                # ReLU (VPU)

    # Global sum-pool (mean scale folded into fc weights) as a second MXU
    # matmul against the block-of-ones selector -> no relayout of acc.
    pooled = jnp.dot(acc, pool_ref[...],
                     preferred_element_type=jnp.float32)       # (Cout, 8)

    # Final linear: contract over Cout directly (no pooled.T), lane-dense out.
    logits = lax.dot_general(
        pooled, fw_ref[...],
        dimension_numbers=(((0,), (0,)), ((), ())),
        preferred_element_type=jnp.float32) + fb_ref[...]      # (8, 128)
    out_ref[...] = logits


# --------------------------------- wrapper ----------------------------------
def init_params(key):
    k1, k2, k3, k4 = jax.random.split(key, 4)
    conv_w = jax.random.normal(k1, (3, 3, CIN, COUT), jnp.float32) * 0.1  # HWIO
    conv_b = jax.random.normal(k2, (1, COUT), jnp.float32) * 0.1
    fc_w = jax.random.normal(k3, (COUT, NUM_CLASSES), jnp.float32) * 0.1
    fc_b = jax.random.normal(k4, (1, NUM_CLASSES), jnp.float32) * 0.1
    return conv_w, conv_b, fc_w, fc_b


def prepare_params(params):
    """One-time parameter massaging (off the per-forward hot path)."""
    conv_w, conv_b, fc_w, fc_b = params
    # HWIO (3,3,Cin,Cout) -> (Cout, 36); K order = tap-major, channel-minor.
    cw = conv_w.reshape(KDIM, COUT).T                             # (Cout, 36)
    # Fold the conv bias in as an extra K column (pairs with the ones row).
    cw = jnp.concatenate([cw, conv_b.reshape(COUT, 1)], axis=1)   # (Cout, 37)
    cw = cw.astype(jnp.bfloat16)
    # Block-of-ones pooling selector: column b sums that batch's H*W columns.
    m = B * H * W
    batch_id = jnp.arange(m) // (H * W)                           # (M,)
    pool_sel = (batch_id[:, None] == jnp.arange(OUT_ROWS)[None, :]
                ).astype(jnp.float32)                             # (M, 8)
    # Fold 1/(H*W) pooling scale into fc weights; pad classes to 128 lanes.
    fw = jnp.pad(fc_w / float(H * W),
                 ((0, 0), (0, LANE - NUM_CLASSES)))               # (Cout, 128)
    fb = jnp.pad(fc_b.reshape(1, NUM_CLASSES),
                 ((0, 0), (0, LANE - NUM_CLASSES)))               # (1, 128)
    return cw, pool_sel, fw, fb


def _im2col(x_nchw):
    """NCHW -> padded NHWC -> im2col patches + ones row, shape (37, B*H*W)."""
    bsz = x_nchw.shape[0]
    x = jnp.transpose(x_nchw, (0, 2, 3, 1)).astype(jnp.float32)   # (B,H,W,Cin)
    xp = jnp.pad(x, ((0, 0), (1, 1), (1, 1), (0, 0)))
    taps = [xp[:, dy:dy + H, dx:dx + W, :]
            for dy in range(3) for dx in range(3)]                # 9 x (B,H,W,Cin)
    p = jnp.stack(taps, axis=3)                                   # (B,H,W,9,Cin)
    p = p.reshape(bsz * H * W, KDIM)                              # (M, 36)
    ones = jnp.ones((bsz * H * W, 1), jnp.float32)
    p = jnp.concatenate([p, ones], axis=1)                        # (M, 37)
    return p.T.astype(jnp.bfloat16)                               # (37, M)


@jax.jit
def bpnet_forward(x_nchw, prepped):
    """BPNet.forward(x) = network(x), with network = conv->ReLU->pool->fc."""
    cw, pool_sel, fw, fb = prepped
    bsz = x_nchw.shape[0]
    patches = _im2col(x_nchw)
    # Everything fits comfortably in VMEM at these sizes -> single invocation,
    # whole-array blocks.
    out = pl.pallas_call(
        bpnet_kernel,
        out_shape=jax.ShapeDtypeStruct((OUT_ROWS, LANE), jnp.float32),
        in_specs=[pl.BlockSpec(memory_space=pltpu.MemorySpace.VMEM)] * 5,
        out_specs=pl.BlockSpec(memory_space=pltpu.MemorySpace.VMEM),
    )(patches, cw, pool_sel, fw, fb)
    return out[:bsz, :NUM_CLASSES]


def reference_forward(x_nchw, params):
    """Pure-JAX (f32) reference of the same network for verification."""
    conv_w, conv_b, fc_w, fc_b = params
    x = jnp.transpose(x_nchw, (0, 2, 3, 1)).astype(jnp.float32)
    y = jax.lax.conv_general_dilated(
        x, conv_w, window_strides=(1, 1), padding="SAME",
        dimension_numbers=("NHWC", "HWIO", "NHWC"))
    y = jnp.maximum(y + conv_b.reshape(1, 1, 1, -1), 0.0)
    pooled = jnp.mean(y, axis=(1, 2))
    return pooled @ fc_w + fc_b.reshape(1, -1)


# TODO(synk): BPNet.train_step / test_step (loss_func, backward, .item()) are
# host-side training-loop logic over autograd, not part of the forward hot
# path, so they are not lowered to Pallas.

if __name__ == "__main__":
    key = jax.random.PRNGKey(0)
    pkey, xkey = jax.random.split(key)
    params = init_params(pkey)
    prepped = prepare_params(params)
    x = jax.random.normal(xkey, (B, CIN, H, W), jnp.float32)  # NCHW like torch

    out = jax.block_until_ready(bpnet_forward(x, prepped))
    ref = reference_forward(x, params)
    assert out.shape == (B, NUM_CLASSES)
    # bf16 conv operands (f32 accumulate) -> ~1e-2 tolerance.
    assert jnp.allclose(out, ref, rtol=1e-2, atol=1e-2)

    print("KERNEL_OK")
</pallas_src>

<mosaic_0001>
module attributes {stable_mosaic.version = 11 : i64} {
  func.func @bpnet_kernel(%arg0: memref<37x512xbf16, #tpu.memory_space<vmem>>, %arg1: memref<8x37xbf16, #tpu.memory_space<vmem>>, %arg2: memref<512x8xf32, #tpu.memory_space<vmem>>, %arg3: memref<8x128xf32, #tpu.memory_space<vmem>>, %arg4: memref<1x128xf32, #tpu.memory_space<vmem>>, %arg5: memref<8x128xf32, #tpu.memory_space<vmem>>) attributes {dimension_semantics = [], scalar_prefetch = 0 : i64, scratch_operands = 0 : i64, tpu.core_type = #tpu.core_type<tc>} {
    %c0 = arith.constant 0 : index
    %c0_0 = arith.constant 0 : index
    %0 = vector.load %arg1[%c0, %c0_0] : memref<8x37xbf16, #tpu.memory_space<vmem>>, vector<8x37xbf16>
    %c0_1 = arith.constant 0 : index
    %c0_2 = arith.constant 0 : index
    %1 = vector.load %arg0[%c0_1, %c0_2] : memref<37x512xbf16, #tpu.memory_space<vmem>>, vector<37x512xbf16>
    %cst = arith.constant dense<0.000000e+00> : vector<8x512xf32>
    %2 = tpu.matmul %0, %1, %cst {dimension_numbers = #tpu.dot_dimension_numbers<[1], [0], [0], [1], [0, 0, 1, 1], [], []>} : vector<8x37xbf16>, vector<37x512xbf16>, vector<8x512xf32> -> vector<8x512xf32>
    %cst_3 = arith.constant 0.000000e+00 : f32
    %3 = vector.broadcast %cst_3 : f32 to vector<8x512xf32>
    %4 = arith.maximumf %2, %3 : vector<8x512xf32>
    %c0_4 = arith.constant 0 : index
    %c0_5 = arith.constant 0 : index
    %5 = vector.load %arg2[%c0_4, %c0_5] : memref<512x8xf32, #tpu.memory_space<vmem>>, vector<512x8xf32>
    %cst_6 = arith.constant dense<0.000000e+00> : vector<8x8xf32>
    %6 = tpu.matmul %4, %5, %cst_6 {dimension_numbers = #tpu.dot_dimension_numbers<[1], [0], [0], [1], [0, 0, 1, 1], [], []>} : vector<8x512xf32>, vector<512x8xf32>, vector<8x8xf32> -> vector<8x8xf32>
    %c0_7 = arith.constant 0 : index
    %c0_8 = arith.constant 0 : index
    %7 = vector.load %arg3[%c0_7, %c0_8] : memref<8x128xf32, #tpu.memory_space<vmem>>, vector<8x128xf32>
    %cst_9 = arith.constant dense<0.000000e+00> : vector<8x128xf32>
    %8 = tpu.matmul %6, %7, %cst_9 {dimension_numbers = #tpu.dot_dimension_numbers<[0], [0], [1], [1], [0, 1, 1, 1], [], []>} : vector<8x8xf32>, vector<8x128xf32>, vector<8x128xf32> -> vector<8x128xf32>
    %c0_10 = arith.constant 0 : index
    %c0_11 = arith.constant 0 : index
    %9 = vector.load %arg4[%c0_10, %c0_11] : memref<1x128xf32, #tpu.memory_space<vmem>>, vector<1x128xf32>
    %10 = vector.broadcast %9 : vector<1x128xf32> to vector<8x128xf32>
    %11 = arith.addf %8, %10 : vector<8x128xf32>
    %c0_12 = arith.constant 0 : index
    %c0_13 = arith.constant 0 : index
    %12 = vector.load %arg5[%c0_12, %c0_13] : memref<8x128xf32, #tpu.memory_space<vmem>>, vector<8x128xf32>
    tpu.vector_store %arg5[%c0_12, %c0_13], %11 {strides = array<i32>} : memref<8x128xf32, #tpu.memory_space<vmem>>, vector<8x128xf32>,
    return
  }
}

</mosaic_0001>

<bundles_post_ra>
// kernel: bpnet_forward.1
= control target key start
LH: loop header
LB: loop body
LE: loop exit
PB: predicated region body
PF: predicated region fallthrough
CT: control target
= control target key end

     0   :  { %vm86_vm0 = vcmask 1041408   ;;  %v688_v1 = vmov 0   ;;  %vm87_vm1 = vcmask 1042432   ;;  %v689_v3 = vmov 65535   ;;  %s958_s0 = inlined_call_operand.vmem [shape: bf16[37,512], index: 0, kind: input, shape index: {}]   ;;  %s959_s2 = inlined_call_operand.vmem [shape: f32[512,8], index: 2, kind: input, shape index: {}]   ;;  %s960_s1 = inlined_call_operand.vmem [shape: bf16[8,37], index: 1, kind: input, shape index: {}]   ;;  %s961_s3 = inlined_call_operand.vmem [shape: f32[8,128], index: 3, kind: input, shape index: {}]   ;;  %s962_s4 = inlined_call_operand.vmem [shape: f32[1,128], index: 4, kind: input, shape index: {}]   ;;  %s963_s5 = inlined_call_operand.vmem [shape: f32[8,128], index: 5, kind: output, shape index: {}]  }
   0x1   :  { %v672_v0 = vld [vmem:[%s958_s0 + $0x4] ss:$16 sps:$4 sm:$0xff]   ;;  %134 = vmatprep.mubr.bf16.mxu0 %v688_v1  ;;  %175 = vmatprep.mubr.bf16.mxu1 %v688_v1  ;;  %v674_v2 = vld [vmem:[%s958_s0 + $0xc] ss:$16 sps:$4 sm:$0xff]   ;;  %v88_v4 = vsel %vm86_vm0, 4294967295, %v689_v3  ;;  %vm82_vm2 = vcmask 302080  }
   0x2   :  { %102 = vmatprep.subr.bf16.mxu0 %v672_v0  ;;  %v676_v5 = vld [vmem:[%s958_s0] ss:$16 sps:$4 sm:$0xff]   ;;  %v677_v6 = vld [vmem:[%s958_s0 + $0x8] ss:$16 sps:$4 sm:$0xff]   ;;  %143 = vmatprep.subr.bf16.mxu1 %v674_v2  ;;  %v678_v7 = vld [vmem:[%s958_s0 + $0x24] ss:$16 sps:$4 sm:$0xff]  }
   0x3   :  { %103 = vmatpush1.bf16.msra.mxu0 %v676_v5  ;;  %144 = vmatpush1.bf16.msra.mxu1 %v677_v6  ;;  %v680_v8 = vld [vmem:[%s958_s0 + $0x2c] ss:$16 sps:$4 sm:$0xff]   ;;  %v682_v9 = vld [vmem:[%s958_s0 + $0x20] ss:$16 sps:$4 sm:$0xff]   ;;  %v89_v10 = vsel %vm87_vm1, %v88_v4, 0  ;;  %vm691_vm3 = vmmov 0  }
   0x4   :  { %104 = vmatprep.subr.bf16.mxu0 %v678_v7  ;;  %v683_v11 = vld [vmem:[%s958_s0 + $0x28] ss:$16 sps:$4 sm:$0xff]   ;;  %v30_v12 = vld [vmem:[%s958_s0 + $0x40] sm:$0x77]  ;;  %145 = vmatprep.subr.bf16.mxu1 %v680_v8  ;;  %v206_v32 = vld [vmem:[%s959_s2 + $0x90] sm:$0xff]  ;;  %vm432_vm4 = vcmask 64512  }
   0x5   :  { %v31_v13 = vld [vmem:[%s958_s0 + $0x48] sm:$0x77]  ;;  %v520_v14 = vcombine.high %v30_v12, %v30_v12  ;;  %v519_v16 = vcombine.low %v30_v12, %v30_v12  ;;  %v204_v18 = vld [vmem:[%s959_s2 + $0x80] sm:$0xff]  ;;  %v207_v33 = vld [vmem:[%s959_s2 + $0x98] sm:$0xff] }
   0x6   :  { %v522_v15 = vcombine.high %v31_v13, %v31_v13  ;;  %v521_v17 = vcombine.low %v31_v13, %v31_v13  ;;  %v205_v19 = vld [vmem:[%s959_s2 + $0x88] sm:$0xff]  ;;  %v236_v20 = vld [vmem:[%s959_s2 + $0x180] sm:$0xff]  ;;  %v238_v34 = vld [vmem:[%s959_s2 + $0x190] sm:$0xff]  ;;  %v608_v41 = vpack.c.bf16 %v207_v33, %v206_v32 }
   0x7   :  { %v237_v21 = vld [vmem:[%s959_s2 + $0x188] sm:$0xff]  ;;  %105 = vmatpush1.bf16.msra.mxu0 %v682_v9  ;;  %146 = vmatpush1.bf16.msra.mxu1 %v683_v11  ;;  %v94_v22 = vand.u32 %v520_v14, %v89_v10  ;;  %v91_v24 = vand.u32 %v519_v16, %v89_v10  ;;  %v188_v25 = vld [vmem:[%s959_s2] sm:$0xff]  ;;  %v604_v28 = vpack.c.bf16 %v205_v19, %v204_v18  ;;  %v239_v35 = vld [vmem:[%s959_s2 + $0x198] sm:$0xff] }
   0x8   :  { %v100_v23 = vand.u32 %v522_v15, %v89_v10  ;;  %v189_v26 = vld [vmem:[%s959_s2 + $0x8] sm:$0xff]  ;;  %v97_v27 = vand.u32 %v521_v17, %v89_v10  ;;  %v636_v29 = vpack.c.bf16 %v237_v21, %v236_v20  ;;  %v220_v30 = vld [vmem:[%s959_s2 + $0x100] sm:$0xff]  ;;  %v190_v39 = vld [vmem:[%s959_s2 + $0x10] sm:$0xff]  ;;  %v640_v42 = vpack.c.bf16 %v239_v35, %v238_v34 }
   0x9   :  { %v221_v31 = vld [vmem:[%s959_s2 + $0x108] sm:$0xff]  ;;  %106 = vmatprep.subr.bf16.mxu0 %v94_v22  ;;  %v21_v36 = vld [vmem:[%s960_s1] sm:$0xf]  ;;  %v606_v37 = vpack.c.bf16 %v189_v26, %v188_v25  ;;  %v191_v40 = vld [vmem:[%s959_s2 + $0x18] sm:$0xff] }
   0xa   :  { %147 = vmatprep.subr.bf16.mxu1 %v100_v23  ;;  %v638_v38 = vpack.c.bf16 %v221_v31, %v220_v30  ;;  %v222_v43 = vld [vmem:[%s959_s2 + $0x110] sm:$0xff]  ;;  %v223_v44 = vld [vmem:[%s959_s2 + $0x118] sm:$0xff]  ;;  %v208_v45 = vld [vmem:[%s959_s2 + $0xa0] sm:$0xff]  ;;  %v610_v49 = vpack.c.bf16 %v191_v40, %v190_v39 }
   0xb   :  { %107 = vmatpush1.bf16.msra.mxu0 %v91_v24  ;;  %148 = vmatpush1.bf16.msra.mxu1 %v97_v27  ;;  %v209_v46 = vld [vmem:[%s959_s2 + $0xa8] sm:$0xff]  ;;  %v240_v47 = vld [vmem:[%s959_s2 + $0x1a0] sm:$0xff]  ;;  %v642_v50 = vpack.c.bf16 %v223_v44, %v222_v43  ;;  %v210_v57 = vld [vmem:[%s959_s2 + $0xb0] sm:$0xff] }
   0xc   :  { %605 = vmatprep.subr.bf16.mxu0 %v604_v28  ;;  %637 = vmatprep.subr.bf16.mxu1 %v636_v29  ;;  %v241_v48 = vld [vmem:[%s959_s2 + $0x1a8] sm:$0xff]  ;;  %v192_v51 = vld [vmem:[%s959_s2 + $0x20] sm:$0xff]  ;;  %v612_v53 = vpack.c.bf16 %v209_v46, %v208_v45  ;;  %v211_v58 = vld [vmem:[%s959_s2 + $0xb8] sm:$0xff] }
   0xd   :  { %v193_v52 = vld [vmem:[%s959_s2 + $0x28] sm:$0xff]  ;;  %v644_v54 = vpack.c.bf16 %v241_v48, %v240_v47  ;;  %v224_v55 = vld [vmem:[%s959_s2 + $0x120] sm:$0xff]  ;;  %v242_v59 = vld [vmem:[%s959_s2 + $0x1b0] sm:$0xff]  ;;  %v616_v1 = vpack.c.bf16 %v211_v58, %v210_v57 }
   0xe   :  { %523 = vmatmul.mubr.msk.bf16.vlgmr.msra.gmra.mrb[0].mxu0 %vm82_vm2, %v21_v36  ;;  %524 = vmatmul.mubr.msk.bf16.vlgmr.msra.gmra.mrb[0].mxu1 %vm82_vm2, %v21_v36  ;;  %v225_v56 = vld [vmem:[%s959_s2 + $0x128] sm:$0xff]  ;;  %v243_v60 = vld [vmem:[%s959_s2 + $0x1b8] sm:$0xff]  ;;  %v614_v61 = vpack.c.bf16 %v193_v52, %v192_v51  ;;  %v194_v63 = vld [vmem:[%s959_s2 + $0x30] sm:$0xff] }
   0xf   :  { %607 = vmatpush3.bf16.msra.mxu0 %v606_v37  ;;  %639 = vmatpush3.bf16.msra.mxu1 %v638_v38  ;;  %v646_v62 = vpack.c.bf16 %v225_v56, %v224_v55  ;;  %v195_v0 = vld [vmem:[%s959_s2 + $0x38] sm:$0xff]  ;;  %v648_v2 = vpack.c.bf16 %v243_v60, %v242_v59  ;;  %v226_v3 = vld [vmem:[%s959_s2 + $0x130] sm:$0xff]  ;;  %v212_v5 = vld [vmem:[%s959_s2 + $0xc0] sm:$0xff] }
  0x10   :  { %609 = vmatprep.subr.bf16.mxu0 %v608_v41  ;;  %641 = vmatprep.subr.bf16.mxu1 %v640_v42  ;;  %v227_v4 = vld [vmem:[%s959_s2 + $0x138] sm:$0xff]  ;;  %v213_v6 = vld [vmem:[%s959_s2 + $0xc8] sm:$0xff]  ;;  %v244_v7 = vld [vmem:[%s959_s2 + $0x1c0] sm:$0xff]  ;;  %v618_v9 = vpack.c.bf16 %v195_v0, %v194_v63 }
  0x11   :  { %v245_v8 = vld [vmem:[%s959_s2 + $0x1c8] sm:$0xff]  ;;  %v650_v10 = vpack.c.bf16 %v227_v4, %v226_v3  ;;  %v196_v11 = vld [vmem:[%s959_s2 + $0x40] sm:$0xff]  ;;  %v620_v13 = vpack.c.bf16 %v213_v6, %v212_v5  ;;  %v214_v17 = vld [vmem:[%s959_s2 + $0xd0] sm:$0xff]  ;;  %v690_v3 = vmov 0.0  }
  0x12   :  { %v197_v12 = vld [vmem:[%s959_s2 + $0x48] sm:$0xff]  ;;  %v652_v14 = vpack.c.bf16 %v245_v8, %v244_v7  ;;  %v228_v15 = vld [vmem:[%s959_s2 + $0x140] sm:$0xff]  ;;  %v215_v18 = vld [vmem:[%s959_s2 + $0xd8] sm:$0xff] }
  0x13   :  { %611 = vmatpush3.bf16.msra.mxu0 %v610_v49  ;;  %643 = vmatpush3.bf16.msra.mxu1 %v642_v50  ;;  %v229_v16 = vld [vmem:[%s959_s2 + $0x148] sm:$0xff]  ;;  %v246_v19 = vld [vmem:[%s959_s2 + $0x1d0] sm:$0xff]  ;;  %v247_v20 = vld [vmem:[%s959_s2 + $0x1d8] sm:$0xff]  ;;  %v622_v21 = vpack.c.bf16 %v197_v12, %v196_v11  ;;  %v624_v25 = vpack.c.bf16 %v215_v18, %v214_v17 }
  0x14   :  { %613 = vmatprep.subr.bf16.mxu0 %v612_v53  ;;  %645 = vmatprep.subr.bf16.mxu1 %v644_v54  ;;  %v654_v22 = vpack.c.bf16 %v229_v16, %v228_v15  ;;  %v198_v23 = vld [vmem:[%s959_s2 + $0x50] sm:$0xff]  ;;  %v199_v24 = vld [vmem:[%s959_s2 + $0x58] sm:$0xff]  ;;  %v656_v26 = vpack.c.bf16 %v247_v20, %v246_v19  ;;  %v216_v29 = vld [vmem:[%s959_s2 + $0xe0] sm:$0xff] }
  0x15   :  { %v230_v27 = vld [vmem:[%s959_s2 + $0x150] sm:$0xff]  ;;  %v231_v28 = vld [vmem:[%s959_s2 + $0x158] sm:$0xff]  ;;  %v217_v30 = vld [vmem:[%s959_s2 + $0xe8] sm:$0xff]  ;;  %v626_v33 = vpack.c.bf16 %v199_v24, %v198_v23 }
  0x16   :  { %v248_v31 = vld [vmem:[%s959_s2 + $0x1e0] sm:$0xff]  ;;  %v249_v32 = vld [vmem:[%s959_s2 + $0x1e8] sm:$0xff]  ;;  %v658_v34 = vpack.c.bf16 %v231_v28, %v230_v27  ;;  %v628_v36 = vpack.c.bf16 %v217_v30, %v216_v29  ;;  %v218_v43 = vld [vmem:[%s959_s2 + $0xf0] sm:$0xff] }
  0x17   :  { %615 = vmatpush3.bf16.msra.mxu0 %v614_v61  ;;  %647 = vmatpush3.bf16.msra.mxu1 %v646_v62  ;;  %v200_v35 = vld [vmem:[%s959_s2 + $0x60] sm:$0xff]  ;;  %v660_v37 = vpack.c.bf16 %v249_v32, %v248_v31  ;;  %v201_v38 = vld [vmem:[%s959_s2 + $0x68] sm:$0xff]  ;;  %v219_v44 = vld [vmem:[%s959_s2 + $0xf8] sm:$0xff] }
  0x18   :  { %617 = vmatprep.subr.bf16.mxu0 %v616_v1  ;;  %649 = vmatprep.subr.bf16.mxu1 %v648_v2  ;;  %v232_v39 = vld [vmem:[%s959_s2 + $0x160] sm:$0xff]  ;;  %v233_v40 = vld [vmem:[%s959_s2 + $0x168] sm:$0xff]  ;;  %v630_v41 = vpack.c.bf16 %v201_v38, %v200_v35  ;;  %v250_v45 = vld [vmem:[%s959_s2 + $0x1f0] sm:$0xff]  ;;  %v632_v46 = vpack.c.bf16 %v219_v44, %v218_v43 }
  0x19   :  { %v662_v42 = vpack.c.bf16 %v233_v40, %v232_v39  ;;  %v251_v47 = vld [vmem:[%s959_s2 + $0x1f8] sm:$0xff]  ;;  %v202_v48 = vld [vmem:[%s959_s2 + $0x70] sm:$0xff]  ;;  %v392_v4 = vld [vmem:[%s961_s3] sm:$0xff] }
  0x1a   :  { %v203_v49 = vld [vmem:[%s959_s2 + $0x78] sm:$0xff]  ;;  %v664_v50 = vpack.c.bf16 %v251_v47, %v250_v45  ;;  %v234_v52 = vld [vmem:[%s959_s2 + $0x170] sm:$0xff] }
  0x1b   :  { %619 = vmatpush3.bf16.msra.mxu0 %v618_v9  ;;  %651 = vmatpush3.bf16.msra.mxu1 %v650_v10  ;;  %v634_v51 = vpack.c.bf16 %v203_v49, %v202_v48  ;;  %v235_v53 = vld [vmem:[%s959_s2 + $0x178] sm:$0xff] }
  0x1c   :  { %621 = vmatprep.subr.bf16.mxu0 %v620_v13  ;;  %653 = vmatprep.subr.bf16.mxu1 %v652_v14  ;;  %v666_v54 = vpack.c.bf16 %v235_v53, %v234_v52  ;;  %v525_v13 = vld [vmem:[%s962_s4] ss:$0 sm:$0xff] }
  0x1f   :  { %623 = vmatpush3.bf16.msra.mxu0 %v622_v21  ;;  %655 = vmatpush3.bf16.msra.mxu1 %v654_v22 }
  0x20   :  { %625 = vmatprep.subr.bf16.mxu0 %v624_v25  ;;  %657 = vmatprep.subr.bf16.mxu1 %v656_v26 }
  0x23   :  { %627 = vmatpush3.bf16.msra.mxu0 %v626_v33  ;;  %659 = vmatpush3.bf16.msra.mxu1 %v658_v34 }
  0x24   :  { %629 = vmatprep.subr.bf16.mxu0 %v628_v36  ;;  %661 = vmatprep.subr.bf16.mxu1 %v660_v37 }
  0x27   :  { %631 = vmatpush3.bf16.msra.mxu0 %v630_v41  ;;  %663 = vmatpush3.bf16.msra.mxu1 %v662_v42 }
  0x28   :  { %633 = vmatprep.subr.bf16.mxu0 %v632_v46  ;;  %665 = vmatprep.subr.bf16.mxu1 %v664_v50 }
  0x2b   :  { %635 = vmatpush3.bf16.msra.mxu0 %v634_v51  ;;  %667 = vmatpush3.bf16.msra.mxu1 %v666_v54 }
  0x2c   :  { %599 = vmatprep.subr.mxu0 %v690_v3 }
  0xe1   :  { %v136_v55 = vpop.f32.mrb[0].mxu0  ;;  %v177_v56 = vpop.f32.mrb[0].mxu1 }
  0xe2   :  { %v138_v57 = vpop.f32.mrb[1].mxu0  ;;  %v179_v58 = vpop.f32.mrb[1].mxu1  ;;  %v184_v63 = vmax.f32 %v136_v55, 0.0  ;;  %v186_v0 = vmax.f32 %v177_v56, 0.0 }
  0xe3   :  { %v185_v59 = vmax.f32 %v138_v57, 0.0  ;;  %v187_v60 = vmax.f32 %v179_v58, 0.0  ;;  %v140_v61 = vpop.f32.mrb[2].mxu0  ;;  %v181_v62 = vpop.f32.mrb[2].mxu1 }
  0xe4   :  { %v141_v1 = vpop.f32.mrb[3].mxu0  ;;  %v182_v2 = vpop.f32.mrb[3].mxu1 }
  0xe5   :  { %316 = vmatprep.mubr.f32.mxu0 %v185_v59  ;;  %386 = vmatprep.mubr.f32.mxu1 %v187_v60 }
  0xe6   :  { %317 = vmatmul.mubr.f32.vlgmr.msra.gmra.mrb[4].mxu0 %v184_v63  ;;  %387 = vmatmul.mubr.f32.vlgmr.msra.gmra.mrb[4].mxu1 %v186_v0 }
  0xe7   :  { %601 = vmatprep.mubr.msk.f32.mxu0 %vm691_vm3, %v690_v3  ;;  %600 = vmatpush3.msra.mxu0 %v392_v4 }
 0x1b9   :  { %v559_v5 = vpop.f32.mrb[4].mxu0  ;;  %v594_v6 = vpop.f32.mrb[4].mxu1 }
 0x1ba   :  { %v560_v7 = vpop.f32.mrb[5].mxu0  ;;  %v595_v8 = vpop.f32.mrb[5].mxu1 }
 0x1bb   :  { %v561_v9 = vadd.f32 %v560_v7, %v559_v5  ;;  %v596_v10 = vadd.f32 %v595_v8, %v594_v6 }
 0x1bd   :  { %v389_v11 = vadd.f32 %v596_v10, %v561_v9 }
 0x1bf   :  { %400 = vxpose.xlu0.b32.start.end [1/1] (short) (narrow) %v389_v11, 8 }
 0x23f   :  { %v416_v12 = vpop.trf.xlu0 }
 0x240   :  { %602 = vmatmul.mubr.msk.f32.vlgmr.msra.gmra.mrb[6].mxu0 %vm432_vm4, %v416_v12 }
 0x313   :  { %v502_v14 = vpop.f32.mrb[6].mxu0 }
 0x314   :  { %v503_v15 = vadd.f32 %v525_v13, %v502_v14  ;;  %v603_v16 = vpop.f32.mrb[7].mxu0 }
 0x316   :  { %506 = vst [vmem:[%s963_s5] sm:$0xff] %v503_v15 }

</bundles_post_ra>
